<compile_context>
chip_gen: v7x
topology: tpu7x:2x2x1
jax: 0.10.0
libtpu: 0.0.40
codegen_flags: <defaults>
</compile_context>

<pallas_src>
import math

import jax
import jax.numpy as jnp
from jax.experimental import pallas as pl
from jax.experimental.pallas import tpu as pltpu


def lyapunov_kernel(xT_ref, w1_ref, b1_ref, w2_ref, b2_ref, w3_ref, b3_ref, o_ref):
    """Fused MLP forward in transposed (feature-major, batch-on-lanes) layout."""
    xT = xT_ref[...]                       # (in_dim, TB)
    w1 = w1_ref[...]                       # (hidden, in_dim)
    in_dim = xT.shape[0]                   # static

    # ---- fc1 + ReLU -------------------------------------------------------
    if in_dim <= 8:
        # Tiny contraction -> VPU broadcast FMAs, skip the MXU entirely.
        acc = w1[:, 0:1] * xT[0:1, :] + b1_ref[...]          # (hidden, TB)
        for k in range(1, in_dim):
            acc = acc + w1[:, k:k + 1] * xT[k:k + 1, :]
    else:
        acc = jnp.dot(w1, xT, preferred_element_type=jnp.float32) + b1_ref[...]
    h1 = jnp.maximum(acc, 0.0)

    # ---- fc2 + ReLU: (hidden, hidden) @ (hidden, TB) -> MXU, N = TB lanes --
    h2 = jnp.dot(w2_ref[...], h1, preferred_element_type=jnp.float32) + b2_ref[...]
    h2 = jnp.maximum(h2, 0.0)

    # ---- fc3 + Softplus (PyTorch: beta=1, threshold=20 -> identity above) --
    z = jnp.dot(w3_ref[...], h2, preferred_element_type=jnp.float32) + b3_ref[...]
    sp = jnp.log1p(jnp.exp(jnp.minimum(z, 20.0)))
    o_ref[...] = jnp.where(z > 20.0, z, sp)                   # (out_dim, TB)


def lyapunov_net_forward(x, params, tb_max=512):
    """x: (B, input_dim) float32. Returns (B, output_dim), matching PyTorch."""
    w1, b1, w2, b2, w3, b3 = (jnp.asarray(p, jnp.float32) for p in params)
    B = x.shape[0]
    in_dim = w1.shape[1]
    out_dim = w3.shape[0]

    xT = jnp.asarray(x, jnp.float32).T      # (in_dim, B) -- batch on lanes

    # Batch tiling: small B runs as a single full-extent block; large B is
    # tiled with a lane-aligned TB (multiple of 128) and zero-padded up to a
    # whole number of tiles.  tb_max=512 keeps double-buffered tiles tiny even
    # against v7x's 64 MiB VMEM.
    if B <= tb_max:
        TB, Bp = B, B
    else:
        TB = max(128, (tb_max // 128) * 128)  # lane-aligned tile
        Bp = pl.cdiv(B, TB) * TB
        if Bp != B:
            xT = jnp.pad(xT, ((0, 0), (0, Bp - B)))
    grid = (Bp // TB,)

    resident = lambda shp: pl.BlockSpec(shp, lambda i: (0, 0))  # stays in VMEM

    outT = pl.pallas_call(
        lyapunov_kernel,
        out_shape=jax.ShapeDtypeStruct((out_dim, Bp), jnp.float32),
        grid_spec=pltpu.PrefetchScalarGridSpec(
            num_scalar_prefetch=0,
            grid=grid,
            in_specs=[
                pl.BlockSpec((in_dim, TB), lambda i: (0, i)),   # x tile (pipelined)
                resident(w1.shape), resident(b1.shape),
                resident(w2.shape), resident(b2.shape),
                resident(w3.shape), resident(b3.shape),
            ],
            out_specs=pl.BlockSpec((out_dim, TB), lambda i: (0, i)),
        ),
        compiler_params=pltpu.CompilerParams(
            # Batch tiles are independent -> parallel (uses both TCs on v7x).
            dimension_semantics=("parallel",)),
    )(xT, w1, b1, w2, b2, w3, b3)

    return outT[:, :B].T                     # back to (B, out_dim)


def init_params(key, input_dim=2, hidden_dim=64, output_dim=1):
    """PyTorch nn.Linear default init; weights stored as (out_features, in_features)."""
    ks = jax.random.split(key, 6)

    def linear(kw, kb, fan_in, fan_out):
        bound = 1.0 / math.sqrt(fan_in)
        w = jax.random.uniform(kw, (fan_out, fan_in), jnp.float32, -bound, bound)
        b = jax.random.uniform(kb, (fan_out, 1), jnp.float32, -bound, bound)
        return w, b

    w1, b1 = linear(ks[0], ks[1], input_dim, hidden_dim)
    w2, b2 = linear(ks[2], ks[3], hidden_dim, hidden_dim)
    w3, b3 = linear(ks[4], ks[5], hidden_dim, output_dim)
    return (w1, b1, w2, b2, w3, b3)


def reference_forward(x, params):
    w1, b1, w2, b2, w3, b3 = params
    h1 = jnp.maximum(x @ w1.T + b1.T, 0.0)
    h2 = jnp.maximum(h1 @ w2.T + b2.T, 0.0)
    z = h2 @ w3.T + b3.T
    return jnp.where(z > 20.0, z, jnp.log1p(jnp.exp(jnp.minimum(z, 20.0))))


if __name__ == "__main__":
    key = jax.random.PRNGKey(0)
    k_param, k_x1, k_x2 = jax.random.split(key, 3)

    B, INPUT_DIM, HIDDEN_DIM, OUTPUT_DIM = 8, 2, 64, 1
    params = init_params(k_param, INPUT_DIM, HIDDEN_DIM, OUTPUT_DIM)

    # Small-batch path (single full-extent block).
    x = jax.random.normal(k_x1, (B, INPUT_DIM), jnp.float32)
    out = jax.block_until_ready(lyapunov_net_forward(x, params))
    ref = reference_forward(x, params)
    assert out.shape == (B, OUTPUT_DIM)
    assert jnp.allclose(out, ref, atol=1e-5, rtol=1e-5)

    # Tiled + padded path (grid > 1, TB = 128, zero padding sliced off).
    B2 = 300
    x2 = jax.random.normal(k_x2, (B2, INPUT_DIM), jnp.float32)
    out2 = jax.block_until_ready(lyapunov_net_forward(x2, params, tb_max=128))
    ref2 = reference_forward(x2, params)
    assert out2.shape == (B2, OUTPUT_DIM)
    assert jnp.allclose(out2, ref2, atol=1e-5, rtol=1e-5)

    print("KERNEL_OK")
</pallas_src>

<mosaic_0001>
module attributes {stable_mosaic.version = 11 : i64} {
  func.func @lyapunov_kernel(%arg0: i32, %arg1: memref<2x8xf32, #tpu.memory_space<vmem>>, %arg2: memref<64x2xf32, #tpu.memory_space<vmem>>, %arg3: memref<64x1xf32, #tpu.memory_space<vmem>>, %arg4: memref<64x64xf32, #tpu.memory_space<vmem>>, %arg5: memref<64x1xf32, #tpu.memory_space<vmem>>, %arg6: memref<1x64xf32, #tpu.memory_space<vmem>>, %arg7: memref<1x1xf32, #tpu.memory_space<vmem>>, %arg8: memref<1x8xf32, #tpu.memory_space<vmem>>) attributes {dimension_semantics = [#tpu.dimension_semantics<parallel>], iteration_bounds = array<i64: 1>, scalar_prefetch = 0 : i64, scratch_operands = 0 : i64, tpu.core_type = #tpu.core_type<tc>, window_params = [{transform_indices = @transform_0, window_bounds = array<i64: 2, 8>}, {pipeline_mode = #tpu.pipeline_mode<synchronous>, transform_indices = @transform_1, window_bounds = array<i64: 64, 2>}, {pipeline_mode = #tpu.pipeline_mode<synchronous>, transform_indices = @transform_2, window_bounds = array<i64: 64, 1>}, {pipeline_mode = #tpu.pipeline_mode<synchronous>, transform_indices = @transform_3, window_bounds = array<i64: 64, 64>}, {pipeline_mode = #tpu.pipeline_mode<synchronous>, transform_indices = @transform_4, window_bounds = array<i64: 64, 1>}, {pipeline_mode = #tpu.pipeline_mode<synchronous>, transform_indices = @transform_5, window_bounds = array<i64: 1, 64>}, {pipeline_mode = #tpu.pipeline_mode<synchronous>, transform_indices = @transform_6, window_bounds = array<i64: 1, 1>}, {transform_indices = @transform_7, window_bounds = array<i64: 1, 8>}]} {
    %c0 = arith.constant 0 : index
    %c0_0 = arith.constant 0 : index
    %0 = vector.load %arg1[%c0, %c0_0] : memref<2x8xf32, #tpu.memory_space<vmem>>, vector<2x8xf32>
    %c0_1 = arith.constant 0 : index
    %c0_2 = arith.constant 0 : index
    %1 = vector.load %arg2[%c0_1, %c0_2] : memref<64x2xf32, #tpu.memory_space<vmem>>, vector<64x2xf32>
    %2 = vector.extract_strided_slice %1 {offsets = [0, 0], sizes = [64, 1], strides = [1, 1]} : vector<64x2xf32> to vector<64x1xf32>
    %3 = vector.extract_strided_slice %0 {offsets = [0, 0], sizes = [1, 8], strides = [1, 1]} : vector<2x8xf32> to vector<1x8xf32>
    %4 = vector.broadcast %2 : vector<64x1xf32> to vector<64x8xf32>
    %5 = vector.broadcast %3 : vector<1x8xf32> to vector<64x8xf32>
    %6 = arith.mulf %4, %5 : vector<64x8xf32>
    %c0_3 = arith.constant 0 : index
    %c0_4 = arith.constant 0 : index
    %7 = vector.load %arg3[%c0_3, %c0_4] : memref<64x1xf32, #tpu.memory_space<vmem>>, vector<64x1xf32>
    %8 = vector.broadcast %7 : vector<64x1xf32> to vector<64x8xf32>
    %9 = arith.addf %6, %8 : vector<64x8xf32>
    %10 = vector.extract_strided_slice %1 {offsets = [0, 1], sizes = [64, 1], strides = [1, 1]} : vector<64x2xf32> to vector<64x1xf32>
    %11 = vector.extract_strided_slice %0 {offsets = [1, 0], sizes = [1, 8], strides = [1, 1]} : vector<2x8xf32> to vector<1x8xf32>
    %12 = vector.broadcast %10 : vector<64x1xf32> to vector<64x8xf32>
    %13 = vector.broadcast %11 : vector<1x8xf32> to vector<64x8xf32>
    %14 = arith.mulf %12, %13 : vector<64x8xf32>
    %15 = arith.addf %9, %14 : vector<64x8xf32>
    %cst = arith.constant 0.000000e+00 : f32
    %16 = vector.broadcast %cst : f32 to vector<64x8xf32>
    %17 = arith.maximumf %15, %16 : vector<64x8xf32>
    %c0_5 = arith.constant 0 : index
    %c0_6 = arith.constant 0 : index
    %18 = vector.load %arg4[%c0_5, %c0_6] : memref<64x64xf32, #tpu.memory_space<vmem>>, vector<64x64xf32>
    %cst_7 = arith.constant dense<0.000000e+00> : vector<64x8xf32>
    %19 = tpu.matmul %18, %17, %cst_7 {dimension_numbers = #tpu.dot_dimension_numbers<[1], [0], [0], [1], [0, 0, 1, 1], [], []>} : vector<64x64xf32>, vector<64x8xf32>, vector<64x8xf32> -> vector<64x8xf32>
    %c0_8 = arith.constant 0 : index
    %c0_9 = arith.constant 0 : index
    %20 = vector.load %arg5[%c0_8, %c0_9] : memref<64x1xf32, #tpu.memory_space<vmem>>, vector<64x1xf32>
    %21 = vector.broadcast %20 : vector<64x1xf32> to vector<64x8xf32>
    %22 = arith.addf %19, %21 : vector<64x8xf32>
    %cst_10 = arith.constant 0.000000e+00 : f32
    %23 = vector.broadcast %cst_10 : f32 to vector<64x8xf32>
    %24 = arith.maximumf %22, %23 : vector<64x8xf32>
    %c0_11 = arith.constant 0 : index
    %c0_12 = arith.constant 0 : index
    %25 = vector.load %arg6[%c0_11, %c0_12] : memref<1x64xf32, #tpu.memory_space<vmem>>, vector<1x64xf32>
    %cst_13 = arith.constant dense<0.000000e+00> : vector<1x8xf32>
    %26 = tpu.matmul %25, %24, %cst_13 {dimension_numbers = #tpu.dot_dimension_numbers<[1], [0], [0], [1], [0, 0, 1, 1], [], []>} : vector<1x64xf32>, vector<64x8xf32>, vector<1x8xf32> -> vector<1x8xf32>
    %c0_14 = arith.constant 0 : index
    %c0_15 = arith.constant 0 : index
    %27 = vector.load %arg7[%c0_14, %c0_15] : memref<1x1xf32, #tpu.memory_space<vmem>>, vector<1x1xf32>
    %28 = vector.broadcast %27 : vector<1x1xf32> to vector<1x8xf32>
    %29 = arith.addf %26, %28 : vector<1x8xf32>
    %cst_16 = arith.constant 2.000000e+01 : f32
    %30 = vector.broadcast %cst_16 : f32 to vector<1x8xf32>
    %31 = arith.minimumf %29, %30 : vector<1x8xf32>
    %32 = math.exp %31 : vector<1x8xf32>
    %33 = math.log1p %32 : vector<1x8xf32>
    %cst_17 = arith.constant 2.000000e+01 : f32
    %34 = vector.broadcast %cst_17 : f32 to vector<1x8xf32>
    %35 = arith.cmpf ogt, %29, %34 : vector<1x8xf32>
    %36 = arith.select %35, %29, %33 : vector<1x8xi1>, vector<1x8xf32>
    %c0_18 = arith.constant 0 : index
    %c0_19 = arith.constant 0 : index
    %37 = vector.load %arg8[%c0_18, %c0_19] : memref<1x8xf32, #tpu.memory_space<vmem>>, vector<1x8xf32>
    tpu.vector_store %arg8[%c0_18, %c0_19], %36 {strides = array<i32>} : memref<1x8xf32, #tpu.memory_space<vmem>>, vector<1x8xf32>,
    return
  }
  func.func @transform_0(%arg0: i32) -> (i32, i32) {
    %c0_i32 = arith.constant 0 : i32
    %c0_i32_0 = arith.constant 0 : i32
    return %c0_i32, %arg0 : i32, i32
  }
  func.func @transform_1(%arg0: i32) -> (i32, i32) {
    %c0_i32 = arith.constant 0 : i32
    %c0_i32_0 = arith.constant 0 : i32
    %c0_i32_1 = arith.constant 0 : i32
    return %c0_i32, %c0_i32_0 : i32, i32
  }
  func.func @transform_2(%arg0: i32) -> (i32, i32) {
    %c0_i32 = arith.constant 0 : i32
    %c0_i32_0 = arith.constant 0 : i32
    %c0_i32_1 = arith.constant 0 : i32
    return %c0_i32, %c0_i32_0 : i32, i32
  }
  func.func @transform_3(%arg0: i32) -> (i32, i32) {
    %c0_i32 = arith.constant 0 : i32
    %c0_i32_0 = arith.constant 0 : i32
    %c0_i32_1 = arith.constant 0 : i32
    return %c0_i32, %c0_i32_0 : i32, i32
  }
  func.func @transform_4(%arg0: i32) -> (i32, i32) {
    %c0_i32 = arith.constant 0 : i32
    %c0_i32_0 = arith.constant 0 : i32
    %c0_i32_1 = arith.constant 0 : i32
    return %c0_i32, %c0_i32_0 : i32, i32
  }
  func.func @transform_5(%arg0: i32) -> (i32, i32) {
    %c0_i32 = arith.constant 0 : i32
    %c0_i32_0 = arith.constant 0 : i32
    %c0_i32_1 = arith.constant 0 : i32
    return %c0_i32, %c0_i32_0 : i32, i32
  }
  func.func @transform_6(%arg0: i32) -> (i32, i32) {
    %c0_i32 = arith.constant 0 : i32
    %c0_i32_0 = arith.constant 0 : i32
    %c0_i32_1 = arith.constant 0 : i32
    return %c0_i32, %c0_i32_0 : i32, i32
  }
  func.func @transform_7(%arg0: i32) -> (i32, i32) {
    %c0_i32 = arith.constant 0 : i32
    %c0_i32_0 = arith.constant 0 : i32
    return %c0_i32, %arg0 : i32, i32
  }
}

</mosaic_0001>

<bundles_post_ra>
// kernel: tpu_custom_call.1
= control target key start
LH: loop header
LB: loop body
LE: loop exit
PB: predicated region body
PF: predicated region fallthrough
CT: control target
= control target key end

     0   :  { %s859_s0 = inlined_call_operand.vmem [shape: f32[2,8], index: 0, kind: input, shape index: {}]   ;;  %s860_s1 = inlined_call_operand.vmem [shape: f32[64,2], index: 1, kind: input, shape index: {}]   ;;  %s861_s2 = inlined_call_operand.vmem [shape: f32[64,1], index: 2, kind: input, shape index: {}]   ;;  %s862_s3 = inlined_call_operand.vmem [shape: f32[64,64], index: 3, kind: input, shape index: {}]   ;;  %s863_s4 = inlined_call_operand.vmem [shape: f32[64,1], index: 4, kind: input, shape index: {}]   ;;  %s864_s5 = inlined_call_operand.vmem [shape: f32[1,64], index: 5, kind: input, shape index: {}]   ;;  %s865_s6 = inlined_call_operand.<no memory space> [shape: f32[1,1], index: 6, kind: input, shape index: {}]   ;;  %s866_s7 = inlined_call_operand.hbm [shape: f32[1,8], index: 7, kind: output, shape index: {}]  }
   0x1   :  { %v12_v0 = vstv %s865_s6 }
   0x2   :  { %13 = vst [vmem:[#allocation2] sm:$0x1] %v12_v0 }
   0x3   :  { %v90_v1 = vld [vmem:[%s861_s2] sm:$0xff]  ;;  %v669_v3 = vmov 0   ;;  %v91_v4 = vld [vmem:[%s861_s2 + $0x8] sm:$0xff] }
   0x4   :  { %v30_v2 = vld [vmem:[%s860_s1] sm:$0xff]  ;;  %630 = vset.pattern.permute.xlu1 %v669_v3  ;;  %629 = vset.pattern.permute.xlu0 %v669_v3  ;;  %v31_v5 = vld [vmem:[%s860_s1 + $0x8] sm:$0xff] }
   0x5   :  { %100 = vperm.xlu1 %630, %v90_v1   ;;  %40 = vperm.xlu0 %629, %v30_v2  }
   0x6   :  { %14 = vsyncpa [#allocation4], 0  ;;  %v33_v6 = vld [vmem:[%s860_s1 + $0x18] sm:$0xff]  ;;  %v670_v7 = vmov 1   ;;  %v35_v8 = vld [vmem:[%s860_s1 + $0x28] sm:$0xff]  ;;  %vm262_vm0 = vcmask 523264   ;;  %v78_v31 = vlaneseq }
   0x7   :  { %v32_v9 = vld [vmem:[%s860_s1 + $0x10] sm:$0xff]  ;;  %v37_v10 = vld [vmem:[%s860_s1 + $0x38] sm:$0xff]  ;;  %v34_v13 = vld [vmem:[%s860_s1 + $0x20] sm:$0xff]  ;;  %vm672_vm1 = vmmov 0   ;;  %vm498_vm3 = vcmask 57344  }
   0x8   :  { %v92_v11 = vld [vmem:[%s861_s2 + $0x10] sm:$0xff]  ;;  %v93_v12 = vld [vmem:[%s861_s2 + $0x18] sm:$0xff]  ;;  %v94_v15 = vld [vmem:[%s861_s2 + $0x20] sm:$0xff]  ;;  %v794_v34 = vshrl.u32 %v78_v31, 7 }
   0x9   :  { %105 = vperm.xlu1 %630, %v91_v4   ;;  %45 = vperm.xlu0 %629, %v31_v5   ;;  %v36_v14 = vld [vmem:[%s860_s1 + $0x30] sm:$0xff]  ;;  %v95_v16 = vld [vmem:[%s861_s2 + $0x28] sm:$0xff]  ;;  %v97_v18 = vld [vmem:[%s861_s2 + $0x38] sm:$0xff] }
   0xa   :  { %v96_v17 = vld [vmem:[%s861_s2 + $0x30] sm:$0xff]  ;;  %v206_v19 = vld [vmem:[%s862_s3] sm:$0xff]  ;;  %v215_v21 = vld [vmem:[%s863_s4 + $0x8] sm:$0xff]  ;;  %v80_v37 = vsub.s32 0, %v794_v34  ;;  %v180_v38 = vsub.s32 1, %v794_v34 }
   0xb   :  { %564 = vmatprep.mubr.msk.f32.mxu0 %vm262_vm0, %v206_v19  ;;  %v214_v20 = vld [vmem:[%s863_s4] sm:$0xff]  ;;  %v216_v22 = vld [vmem:[%s863_s4 + $0x10] sm:$0xff]  ;;  %v217_v24 = vld [vmem:[%s863_s4 + $0x18] sm:$0xff] }
   0xc   :  { %v218_v23 = vld [vmem:[%s863_s4 + $0x20] sm:$0xff]  ;;  %v220_v25 = vld [vmem:[%s863_s4 + $0x30] sm:$0xff]  ;;  %v219_v26 = vld [vmem:[%s863_s4 + $0x28] sm:$0xff] }
   0xd   :  { %631 = vset.pattern.permute.xlu1 %v670_v7  ;;  %55 = vperm.xlu0 %629, %v33_v6   ;;  %v401_v27 = vld [vmem:[#allocation2] sm:$0x1]  ;;  %v221_v28 = vld [vmem:[%s863_s4 + $0x38] sm:$0xff] }
   0xe   :  { %151 = vperm.xlu1 %631, %v31_v5   ;;  %v29_v39 = vld [vmem:[%s859_s0] sm:$0x3] }
   0xf   :  { %v81_v41 = vrot.slane %v29_v39, %v80_v37  ;;  %v803_v42 = vrot.slane %v29_v39, %v180_v38 }
  0x11   :  { %65 = vperm.xlu0 %629, %v35_v8  }
  0x12   :  { %632 = vset.pattern.permute.xlu1 %v669_v3 }
  0x13   :  { %50 = vperm.xlu1 %632, %v32_v9  }
  0x15   :  { %75 = vperm.xlu0 %629, %v37_v10  }
  0x17   :  { %110 = vperm.xlu1 %632, %v92_v11  }
  0x19   :  { %637 = vset.pattern.permute.xlu0 %v670_v7 }
  0x1a   :  { %147 = vperm.xlu0 %637, %v30_v2  }
  0x1b   :  { %115 = vperm.xlu1 %632, %v93_v12  }
  0x1e   :  { %155 = vperm.xlu0 %637, %v32_v9  }
  0x1f   :  { %633 = vset.pattern.permute.xlu1 %v670_v7 }
  0x20   :  { %159 = vperm.xlu1 %633, %v33_v6  }
  0x22   :  { %163 = vperm.xlu0 %637, %v34_v13  }
  0x24   :  { %634 = vset.pattern.permute.xlu1 %v669_v3 }
  0x25   :  { %60 = vperm.xlu1 %634, %v34_v13  }
  0x26   :  { %171 = vperm.xlu0 %637, %v36_v14  }
  0x29   :  { %120 = vperm.xlu1 %634, %v94_v15  }
  0x2a   :  { %640 = vset.pattern.permute.xlu0 %v669_v3 }
  0x2b   :  { %229 = vperm.xlu0 %640, %v215_v21  }
  0x2d   :  { %125 = vperm.xlu1 %634, %v95_v16  }
  0x2f   :  { %244 = vperm.xlu0 %640, %v218_v23  }
  0x31   :  { %635 = vset.pattern.permute.xlu1 %v670_v7 }
  0x32   :  { %167 = vperm.xlu1 %635, %v35_v8  }
  0x33   :  { %254 = vperm.xlu0 %640, %v220_v25  }
  0x36   :  { %636 = vset.pattern.permute.xlu1 %v669_v3 }
  0x37   :  { %70 = vperm.xlu1 %636, %v36_v14   ;;  %404 = vperm.xlu0 %640, %v401_v27  }
  0x3b   :  { %130 = vperm.xlu1 %636, %v96_v17  }
  0x3f   :  { %135 = vperm.xlu1 %636, %v97_v18  }
  0x43   :  { %638 = vset.pattern.permute.xlu1 %v670_v7 }
  0x44   :  { %175 = vperm.xlu1 %638, %v37_v10  }
  0x48   :  { %639 = vset.pattern.permute.xlu1 %v669_v3 }
  0x49   :  { %224 = vperm.xlu1 %639, %v214_v20  }
  0x4d   :  { %234 = vperm.xlu1 %639, %v216_v22  }
  0x51   :  { %239 = vperm.xlu1 %639, %v217_v24  }
  0x55   :  { %249 = vperm.xlu1 %639, %v219_v26  }
  0x59   :  { %259 = vperm.xlu1 %639, %v221_v28  }
  0x84   :  { %v101_v29 = vpop.permute.xlu1 %100  ;;  %v41_v30 = vpop.permute.xlu0 %40 }
  0x85   :  { %v82_v46 = vmul.f32 %v81_v41, %v41_v30 }
  0x87   :  { %v138_v51 = vadd.f32 %v101_v29, %v82_v46  ;;  %v211_v46 = vld [vmem:[%s862_s3 + $0x28] sm:$0xff] }
  0x88   :  { %v106_v32 = vpop.permute.xlu1 %105  ;;  %v46_v33 = vpop.permute.xlu0 %45 }
  0x89   :  { %v83_v44 = vmul.f32 %v81_v41, %v46_v33 }
  0x8b   :  { %v139_v49 = vadd.f32 %v106_v32, %v83_v44  ;;  %v207_v44 = vld [vmem:[%s862_s3 + $0x8] sm:$0xff] }
  0x8c   :  { %v56_v35 = vpop.permute.xlu0 %55 }
  0x8d   :  { %v152_v36 = vpop.permute.xlu1 %151  ;;  %v85_v55 = vmul.f32 %v81_v41, %v56_v35 }
  0x8e   :  { %v183_v47 = vmul.f32 %v803_v42, %v152_v36 }
  0x90   :  { %v66_v40 = vpop.permute.xlu0 %65  ;;  %v191_v52 = vadd.f32 %v183_v47, %v139_v49  ;;  %v212_v47 = vld [vmem:[%s862_s3 + $0x30] sm:$0xff]  ;;  %v671_v49 = vmov 0.0|0.0  }
  0x91   :  { %v87_v15 = vmul.f32 %v81_v41, %v66_v40  ;;  %611 = vmatprep.subr.bf16.mxu1 %v671_v49 }
  0x92   :  { %v51_v43 = vpop.permute.xlu1 %50  ;;  %v199_v59 = vmax.f32 %v191_v52, 0.0 }
  0x93   :  { %v84_v56 = vmul.f32 %v81_v41, %v51_v43 }
  0x94   :  { %v76_v45 = vpop.permute.xlu0 %75 }
  0x95   :  { %v89_v30 = vmul.f32 %v81_v41, %v76_v45  ;;  %v210_v45 = vld [vmem:[%s862_s3 + $0x20] sm:$0xff] }
  0x96   :  { %v111_v48 = vpop.permute.xlu1 %110 }
  0x97   :  { %v140_v60 = vadd.f32 %v111_v48, %v84_v56  ;;  %v213_v48 = vld [vmem:[%s862_s3 + $0x38] sm:$0xff] }
  0x99   :  { %v148_v50 = vpop.permute.xlu0 %147 }
  0x9a   :  { %v182_v53 = vmul.f32 %v803_v42, %v148_v50  ;;  %v116_v54 = vpop.permute.xlu1 %115  ;;  %v673_v50 = vmov 0.0  }
  0x9b   :  { %v141_v0 = vadd.f32 %v116_v54, %v85_v55  ;;  %592 = vmatprep.mubr.msk.f32.mxu1 %vm672_vm1, %v673_v50 }
  0x9c   :  { %v190_v57 = vadd.f32 %v182_v53, %v138_v51 }
  0x9d   :  { %v156_v58 = vpop.permute.xlu0 %155 }
  0x9e   :  { %v198_v61 = vmax.f32 %v190_v57, 0.0  ;;  %v184_v62 = vmul.f32 %v803_v42, %v156_v58 }
  0x9f   :  { %v160_v63 = vpop.permute.xlu1 %159 }
  0xa0   :  { %v192_v1 = vadd.f32 %v184_v62, %v140_v60  ;;  %v185_v2 = vmul.f32 %v803_v42, %v160_v63  ;;  %v595_v3 = vpack.c.bf16 %v199_v59, %v198_v61 }
  0xa1   :  { %v164_v10 = vpop.permute.xlu0 %163 }
  0xa2   :  { %v193_v4 = vadd.f32 %v185_v2, %v141_v0  ;;  %596 = vmatprep.subr.bf16.mxu0 %v595_v3  ;;  %v200_v5 = vmax.f32 %v192_v1, 0.0  ;;  %v186_v14 = vmul.f32 %v803_v42, %v164_v10 }
  0xa3   :  { %598 = vmatpush3.bf16.msra.mxu0 %v595_v3 }
  0xa4   :  { %v201_v6 = vmax.f32 %v193_v4, 0.0  ;;  %v61_v7 = vpop.permute.xlu1 %60 }
  0xa5   :  { %v86_v11 = vmul.f32 %v81_v41, %v61_v7  ;;  %v172_v28 = vpop.permute.xlu0 %171 }
  0xa6   :  { %v599_v8 = vpack.c.bf16 %v201_v6, %v200_v5  ;;  %v188_v31 = vmul.f32 %v803_v42, %v172_v28 }
  0xa8   :  { %v121_v9 = vpop.permute.xlu1 %120  ;;  %600 = vmatprep.subr.bf16.mxu0 %v599_v8 }
  0xa9   :  { %602 = vmatpush3.bf16.msra.mxu0 %v599_v8  ;;  %v142_v13 = vadd.f32 %v121_v9, %v86_v11 }
  0xaa   :  { %v230_v53 = vpop.permute.xlu0 %229 }
  0xab   :  { %v194_v17 = vadd.f32 %v186_v14, %v142_v13 }
  0xac   :  { %v126_v12 = vpop.permute.xlu1 %125 }
  0xad   :  { %v143_v18 = vadd.f32 %v126_v12, %v87_v15  ;;  %v202_v21 = vmax.f32 %v194_v17, 0.0 }
  0xae   :  { %v245_v3 = vpop.permute.xlu0 %244 }
  0xb1   :  { %v168_v16 = vpop.permute.xlu1 %167 }
  0xb2   :  { %v187_v19 = vmul.f32 %v803_v42, %v168_v16  ;;  %v255_v15 = vpop.permute.xlu0 %254 }
  0xb4   :  { %v195_v20 = vadd.f32 %v187_v19, %v143_v18 }
  0xb6   :  { %v203_v22 = vmax.f32 %v195_v20, 0.0  ;;  %v71_v23 = vpop.permute.xlu1 %70 }
  0xb7   :  { %v88_v26 = vmul.f32 %v81_v41, %v71_v23  ;;  %v208_v41 = vld [vmem:[%s862_s3 + $0x10] sm:$0xff]  ;;  %v400_v23 = vld [vmem:[%s864_s5] sm:$0x1]  ;;  %s674_s5 = smov [#allocation3]  }
  0xb8   :  { %v603_v24 = vpack.c.bf16 %v203_v22, %v202_v21  ;;  %s506_s15 = sshll.u32 %s674_s5, 4  ;;  %s507_s15 = int_to_ptr.vmem [resolvable:$true] %s506_s15 }
  0xb9   :  { %s645_s16 = scalar_lea.vmem %s507_s15, 16  ;;  %s649_s17 = scalar_lea.vmem %s507_s15, 32 }
  0xba   :  { %v131_v25 = vpop.permute.xlu1 %130  ;;  %604 = vmatprep.subr.bf16.mxu0 %v603_v24  ;;  %p646_p0 = scmp.ne.s32.totalorder %s507_s15, %s645_s16  ;;  %p650_p1 = scmp.lt.s32.totalorder %s507_s15, %s507_s15 }
  0xbb   :  { %606 = vmatpush3.bf16.msra.mxu0 %v603_v24  ;;  %v144_v29 = vadd.f32 %v131_v25, %v88_v26  ;;  %v405_v24 = vpop.permute.xlu0 %404  ;;  %p651_p2 = scmp.lt.s32.totalorder %s649_s17, %s645_s16 }
  0xbc   :  { %v410_v25 = vrot.slane %v405_v24, %v80_v37 }
  0xbd   :  { %v196_v33 = vadd.f32 %v188_v31, %v144_v29  ;;  %p652_p3 = por %p651_p2, %p650_p1 }
  0xbe   :  { %v136_v27 = vpop.permute.xlu1 %135 }
  0xbf   :  { %v145_v35 = vadd.f32 %v136_v27, %v89_v30  ;;  %v204_v39 = vmax.f32 %v196_v33, 0.0  ;;  %p653_p4 = pnand %p652_p3, %p646_p0 }
  0xc3   :  { %v176_v32 = vpop.permute.xlu1 %175 }
  0xc4   :  { %v189_v36 = vmul.f32 %v803_v42, %v176_v32  ;;  %v209_v42 = vld [vmem:[%s862_s3 + $0x18] sm:$0xff] }
  0xc6   :  { %v197_v38 = vadd.f32 %v189_v36, %v145_v35 }
  0xc8   :  { %v205_v40 = vmax.f32 %v197_v38, 0.0  ;;  %v225_v51 = vpop.permute.xlu1 %224 }
  0xca   :  { %v607_v43 = vpack.c.bf16 %v205_v40, %v204_v39 }
  0xcc   :  { %608 = vmatprep.subr.bf16.mxu0 %v607_v43  ;;  %v235_v52 = vpop.permute.xlu1 %234 }
  0xcd   :  { %610 = vmatpush3.bf16.msra.mxu0 %v607_v43 }
  0xd0   :  { %565 = vmatmul.mubr.msk.f32.vlgmr.msra.gmra.mrb[0].mxu0 %vm262_vm0, %v207_v44  ;;  %v240_v54 = vpop.permute.xlu1 %239 }
  0xd1   :  { %567 = vmatprep.mubr.msk.f32.mxu0 %vm262_vm0, %v208_v41 }
  0xd4   :  { %568 = vmatmul.mubr.msk.f32.gmra.mrb[2].mxu0 %vm262_vm0, %v209_v42  ;;  %v250_v0 = vpop.permute.xlu1 %249 }
  0xd5   :  { %570 = vmatprep.mubr.msk.f32.mxu0 %vm262_vm0, %v210_v45 }
  0xd8   :  { %571 = vmatmul.mubr.msk.f32.gmra.mrb[4].mxu0 %vm262_vm0, %v211_v46  ;;  %v260_v12 = vpop.permute.xlu1 %259 }
  0xd9   :  { %573 = vmatprep.mubr.msk.f32.mxu0 %vm262_vm0, %v212_v47 }
  0xdc   :  { %574 = vmatmul.mubr.msk.f32.gmra.mrb[6].mxu0 %vm262_vm0, %v213_v48 }
 0x1a3   :  { %v566_v55 = vpop.f32.mrb[0].mxu0 }
 0x1a4   :  { %v359_v56 = vadd.f32 %v566_v55, %v230_v53  ;;  %v353_v57 = vpop.f32.mrb[1].mxu0 }
 0x1a5   :  { %v354_v58 = vadd.f32 %v353_v57, %v225_v51 }
 0x1a6   :  { %v393_v59 = vmax.f32 %v359_v56, 0.0 }
 0x1a7   :  { %v392_v60 = vmax.f32 %v354_v58, 0.0  ;;  %v569_v61 = vpop.f32.mrb[2].mxu0 }
 0x1a8   :  { %v369_v62 = vadd.f32 %v569_v61, %v240_v54  ;;  %v363_v63 = vpop.f32.mrb[3].mxu0 }
 0x1a9   :  { %v364_v1 = vadd.f32 %v363_v63, %v235_v52  ;;  %v612_v2 = vpack.c.bf16 %v393_v59, %v392_v60 }
 0x1aa   :  { %v395_v4 = vmax.f32 %v369_v62, 0.0 }
 0x1ab   :  { %v394_v5 = vmax.f32 %v364_v1, 0.0  ;;  %v572_v6 = vpop.f32.mrb[4].mxu0  ;;  %613 = vmatpush3.bf16.msra.mxu1 %v612_v2 }
 0x1ac   :  { %v379_v7 = vadd.f32 %v572_v6, %v250_v0  ;;  %v373_v8 = vpop.f32.mrb[5].mxu0  ;;  %614 = vmatprep.subr.bf16.mxu1 %v671_v49 }
 0x1ad   :  { %v615_v9 = vpack.c.bf16 %v395_v4, %v394_v5  ;;  %v374_v10 = vadd.f32 %v373_v8, %v245_v3 }
 0x1ae   :  { %v397_v11 = vmax.f32 %v379_v7, 0.0 }
 0x1af   :  { %v396_v13 = vmax.f32 %v374_v10, 0.0  ;;  %v575_v14 = vpop.f32.mrb[6].mxu0  ;;  %616 = vmatpush3.bf16.msra.mxu1 %v615_v9 }
 0x1b0   :  { %v389_v16 = vadd.f32 %v575_v14, %v260_v12  ;;  %v383_v17 = vpop.f32.mrb[7].mxu0  ;;  %617 = vmatprep.subr.bf16.mxu1 %v671_v49 }
 0x1b1   :  { %v618_v18 = vpack.c.bf16 %v397_v11, %v396_v13  ;;  %v384_v19 = vadd.f32 %v383_v17, %v255_v15 }
 0x1b2   :  { %v399_v20 = vmax.f32 %v389_v16, 0.0 }
 0x1b3   :  { %v398_v21 = vmax.f32 %v384_v19, 0.0  ;;  %619 = vmatpush3.bf16.msra.mxu1 %v618_v18 }
 0x1b4   :  { %620 = vmatprep.subr.bf16.mxu1 %v671_v49 }
 0x1b5   :  { %v621_v22 = vpack.c.bf16 %v399_v20, %v398_v21 }
 0x1b7   :  { %622 = vmatpush3.bf16.msra.mxu1 %v621_v22 }
 0x1ba   :  { %593 = vmatmul.mubr.msk.f32.vlgmr.msra.gmra.mrb[0].mxu1 %vm262_vm0, %v400_v23 }
 0x28d   :  { %v480_v26 = vpop.f32.mrb[0].mxu1 }
 0x28e   :  { %v481_v27 = vadd.f32 %v480_v26, %v410_v25  ;;  %v594_v28 = vpop.f32.mrb[1].mxu1 }
 0x290   :  { %v484_v29 = vmin.f32 %v481_v27, 20.0  ;;  %vm496_vm4 = vcmp.gt.f32.partialorder %v481_v27, 20.0 }
 0x292   :  { %v485_v30 = vmul.f32 1.442695, %v484_v29 }
 0x294   :  { %641 = vpow2.f32 %v485_v30 }
 0x29e   :  { %v642_v31 = vpop.eup %641 }
 0x29f   :  { %v487_v32 = vadd.f32 1.0, %v642_v31  ;;  %v490_v33 = vmul.f32 -0.5, %v642_v31  ;;  %v493_v36 = vand.u32 2147483647, %v642_v31 }
 0x2a1   :  { %643 = vlog2.f32 %v487_v32  ;;  %v491_v35 = vadd.f32 1.0, %v490_v33  ;;  %vm494_vm2 = vcmp.lt.f32.partialorder %v493_v36, 0.0004427343 }
 0x2a3   :  { %v492_v40 = vmul.f32 %v642_v31, %v491_v35 }
 0x2ab   :  { %v644_v38 = vpop.eup %643 }
 0x2ac   :  { %v489_v39 = vmul.f32 0.6931472, %v644_v38 }
 0x2ae   :  { %v495_v34 = vsel %vm494_vm2, %v492_v40, %v489_v39 }
 0x2af   :  { %v497_v37 = vsel %vm496_vm4, %v481_v27, %v495_v34 }
 0x2b0   :  { %499 = vst.msk [vmem:[#allocation3] sm:$0x1] %vm498_vm3, %v497_v37 }
 0x2b1   :  { %656 = shalt.err (!%p653_p4)
}
 0x2b2   :  { %s657_s20 = scalar_lea.hbm %s866_s7, 16 }
 0x2b3   :  { %p658_p5 = scmp.ne.s32.totalorder %s866_s7, %s657_s20  ;;  %p661_p6 = scmp.lt.u32.totalorder %s657_s20, %s866_s7 }
 0x2b5   :  { %p663_p7 = pnand %p661_p6, %p658_p5 }
 0x2b7   :  { %666 = shalt.err (!%p663_p7)
}
 0x2b8   :  { %509 = dma.vmem_to_hbm [thread:$0]  %s507_s15, 16, %s866_s7, [#allocation4]  }
 0x2b9   :  { %667 = dma.done.wait [#allocation4], 16  }
 0x2ba   :  { %668 = vsyncadd [#allocation4], 4294967280 }
 0x2bb   :  { %513 = vsyncpa [#allocation4], 1 }

</bundles_post_ra>
